<compile_context>
chip_gen: v7x
topology: tpu7x:2x2x1
jax: 0.10.0
libtpu: 0.0.40
codegen_flags: <defaults>
</compile_context>

<pallas_src>
import functools
import math

import jax
import jax.numpy as jnp
from jax import lax
from jax.experimental import pallas as pl
from jax.experimental.pallas import tpu as pltpu


def _gelu_exact(x):
    # PyTorch nn.GELU() default is the exact (erf) formulation.
    return 0.5 * x * (1.0 + lax.erf(x * (1.0 / math.sqrt(2.0))))


def _gelu_tanh(x):
    c = math.sqrt(2.0 / math.pi)
    return 0.5 * x * (1.0 + jnp.tanh(c * (x + 0.044715 * x * x * x)))


def _round_up(a, m):
    return (a + m - 1) // m * m


def dnn_nllloss_kernel(x_ref, w0_ref, b0_ref, w12t_ref, b12_ref, o_ref, *,
                       approximate_gelu):
    # x_ref:   (tile_rows, P*n_in)  -- P samples packed per row (lane-dense)
    # w0_ref:  (P*n_in, P*H)        -- block-diagonal first Linear
    # b0_ref:  (1, P*H)
    # w12t_ref:(P, P*H)             -- folded (W1@W2)^T, block-structured
    # b12_ref: (1, 1) scalar in SMEM
    # o_ref:   (P, tile_rows)       -- lane-major outputs
    x = x_ref[...]
    h = jnp.dot(x, w0_ref[...], preferred_element_type=jnp.float32)   # MXU
    h = h + b0_ref[...]
    h = _gelu_tanh(h) if approximate_gelu else _gelu_exact(h)          # VPU/EUP
    # Folded H->1 projection per packed sample.  Contract BOTH operands on the
    # lane dim so the result is produced lane-major as (P, tile_rows).
    y = lax.dot_general(w12t_ref[...], h,
                        dimension_numbers=(((1,), (1,)), ((), ())),
                        preferred_element_type=jnp.float32)            # (P, rows)
    o_ref[...] = jnp.exp(y + b12_ref[0, 0])                            # EUP exp


def dnn_nllloss_forward(x, w0, b0, w1, b1, w2, b2, *, block_b=8192,
                        approximate_gelu=False):
    B, n_in = x.shape
    H = w0.shape[1]

    # ---- one-time weight prep (tiny XLA ops) --------------------------------
    # Fold the activation-free tail: y = h@(W1@W2) + (b1@W2 + b2).
    w12 = w1 @ w2                               # (H, 1)
    b12 = (b1 @ w2 + b2).reshape(1, 1)          # scalar -> SMEM

    # Pack P samples per row so x / h / GELU are lane-dense.
    P = 4 if B % 4 == 0 else (2 if B % 2 == 0 else 1)
    eye = jnp.eye(P, dtype=w0.dtype)
    w0p = jnp.kron(eye, w0)                     # (P*n_in, P*H) block-diagonal
    b0p = jnp.tile(b0, (1, P))                  # (1, P*H)
    w12tp = jnp.kron(eye, w12.T)                # (P, P*H)

    xp = x.reshape(B // P, P * n_in)            # contiguous row-major: free view
    rows = B // P

    # ---- batch tiling (no jnp.pad; ragged last tile) ------------------------
    max_rows = max(block_b // P, 8)
    if rows >= 16:
        num_tiles = max(2, pl.cdiv(rows, max_rows))   # >=2 tiles: v7x megacore
        if num_tiles % 2:
            num_tiles += 1                            # even grid for 2 TCs
        tile_rows = _round_up(pl.cdiv(rows, num_tiles), 8)
        num_tiles = pl.cdiv(rows, tile_rows)
    else:
        tile_rows, num_tiles = rows, 1                # tiny batch: single tile

    cost = pl.CostEstimate(
        flops=2 * B * H * (n_in + 1),
        transcendentals=B * (H + 1),                  # erf per hidden + exp
        bytes_accessed=4 * (B * n_in + B + P * P * (n_in * H + H) + P * H + 1),
    )

    kernel = functools.partial(dnn_nllloss_kernel,
                               approximate_gelu=approximate_gelu)

    out = pl.pallas_call(
        kernel,
        out_shape=jax.ShapeDtypeStruct((num_tiles, P, tile_rows), jnp.float32),
        grid=(num_tiles,),
        in_specs=[
            pl.BlockSpec((tile_rows, P * n_in), lambda i: (i, 0)),   # x: tiled
            pl.BlockSpec((P * n_in, P * H), lambda i: (0, 0)),       # W0 (blockdiag)
            pl.BlockSpec((1, P * H), lambda i: (0, 0)),              # b0
            pl.BlockSpec((P, P * H), lambda i: (0, 0)),              # (W1@W2)^T packed
            pl.BlockSpec(memory_space=pltpu.MemorySpace.SMEM),       # folded scalar bias
        ],
        out_specs=pl.BlockSpec((None, P, tile_rows), lambda i: (i, 0, 0)),
        compiler_params=pltpu.CompilerParams(
            dimension_semantics=("parallel",),
            # Explicit scoped-VMEM cap: > v5e's 16 MiB default, < v7x's 64 MiB
            # physical.  Actual footprint is a few MiB even at block_b=8192.
            vmem_limit_bytes=48 * 1024 * 1024,
        ),
        cost_estimate=cost,
    )(xp, w0p, b0p, w12tp, b12)

    # Un-permute packed lanes: out[t, s, j] is sample (t*tile_rows + j)*P + s.
    flat = out.transpose(0, 2, 1).reshape(num_tiles * tile_rows * P, 1)
    return flat[:B]


def init_params(key, n_inputs, n_hidden):
    """Deterministic PyTorch-style uniform init: U(-1/sqrt(fan_in), 1/sqrt(fan_in))."""
    ks = jax.random.split(key, 6)

    def lin(kw, kb, fan_in, fan_out):
        bound = 1.0 / math.sqrt(fan_in)
        # stored as (fan_in, fan_out) = W.T relative to PyTorch's (out, in)
        w = jax.random.uniform(kw, (fan_in, fan_out), jnp.float32, -bound, bound)
        b = jax.random.uniform(kb, (1, fan_out), jnp.float32, -bound, bound)
        return w, b

    w0, b0 = lin(ks[0], ks[1], n_inputs, n_hidden)
    w1, b1 = lin(ks[2], ks[3], n_hidden, n_hidden)
    w2, b2 = lin(ks[4], ks[5], n_hidden, 1)
    return w0, b0, w1, b1, w2, b2


def reference_forward(x, w0, b0, w1, b1, w2, b2):
    # Unfused math, matching the PyTorch module exactly.
    h = x @ w0 + b0
    h = _gelu_exact(h)
    h = h @ w1 + b1
    y = h @ w2 + b2
    return jnp.exp(y)


# TODO(synk): fit() (Adam training loop / NLL objective) is host-side training
# code, not part of the forward pass, and is intentionally not kernelized.

if __name__ == "__main__":
    # dnn_nllloss(n_inputs=32, n_hidden=64, num_layers=1)
    n_inputs, n_hidden = 32, 64

    key = jax.random.PRNGKey(0)
    kx, kp = jax.random.split(key)
    params = init_params(kp, n_inputs, n_hidden)

    # Exercise: multi-tile ragged grid with P=4 (B=1000), P=2 (B=998),
    # odd-batch P=1 fallback (B=37), and the tiny single-tile path (B=8).
    for B in (1000, 998, 37, 8):
        x = jax.random.normal(jax.random.fold_in(kx, B), (B, n_inputs), jnp.float32)
        out = jax.block_until_ready(dnn_nllloss_forward(x, *params))
        ref = reference_forward(x, *params)
        assert out.shape == (B, 1), out.shape
        # rtol relaxed vs. 1e-5: the W1@W2 fold reassociates f32 sums (intentional).
        assert jnp.allclose(out, ref, rtol=5e-4, atol=1e-5), (
            B, float(jnp.max(jnp.abs(out - ref))))

    print("KERNEL_OK")
</pallas_src>

<mosaic_0001>
module attributes {stable_mosaic.version = 11 : i64} {
  func.func @dnn_nllloss_kernel(%arg0: i32, %arg1: memref<128x128xf32, #tpu.memory_space<vmem>>, %arg2: memref<128x256xf32, #tpu.memory_space<vmem>>, %arg3: memref<1x256xf32, #tpu.memory_space<vmem>>, %arg4: memref<4x256xf32, #tpu.memory_space<vmem>>, %arg5: memref<1x1xf32, #tpu.memory_space<smem>>, %arg6: memref<1x4x128xf32, #tpu.memory_space<vmem>>) attributes {dimension_semantics = [#tpu.dimension_semantics<parallel>], iteration_bounds = array<i64: 2>, scalar_prefetch = 0 : i64, scratch_operands = 0 : i64, tpu.core_type = #tpu.core_type<tc>, window_params = [{transform_indices = @transform_0, window_bounds = array<i64: 128, 128>}, {pipeline_mode = #tpu.pipeline_mode<synchronous>, transform_indices = @transform_1, window_bounds = array<i64: 128, 256>}, {pipeline_mode = #tpu.pipeline_mode<synchronous>, transform_indices = @transform_2, window_bounds = array<i64: 1, 256>}, {pipeline_mode = #tpu.pipeline_mode<synchronous>, transform_indices = @transform_3, window_bounds = array<i64: 4, 256>}, {transform_indices = @transform_4, window_bounds = array<i64: 1, 1>}, {transform_indices = @transform_5, window_bounds = array<i64: 1, 4, 128>}]} {
    %c0 = arith.constant 0 : index
    %c0_0 = arith.constant 0 : index
    %0 = vector.load %arg1[%c0, %c0_0] : memref<128x128xf32, #tpu.memory_space<vmem>>, vector<128x128xf32>
    %c0_1 = arith.constant 0 : index
    %c0_2 = arith.constant 0 : index
    %1 = vector.load %arg2[%c0_1, %c0_2] : memref<128x256xf32, #tpu.memory_space<vmem>>, vector<128x256xf32>
    %cst = arith.constant dense<0.000000e+00> : vector<128x256xf32>
    %2 = tpu.matmul %0, %1, %cst {dimension_numbers = #tpu.dot_dimension_numbers<[1], [0], [0], [1], [0, 0, 1, 1], [], []>} : vector<128x128xf32>, vector<128x256xf32>, vector<128x256xf32> -> vector<128x256xf32>
    %c0_3 = arith.constant 0 : index
    %c0_4 = arith.constant 0 : index
    %3 = vector.load %arg3[%c0_3, %c0_4] : memref<1x256xf32, #tpu.memory_space<vmem>>, vector<1x256xf32>
    %4 = vector.broadcast %3 : vector<1x256xf32> to vector<128x256xf32>
    %5 = arith.addf %2, %4 : vector<128x256xf32>
    %cst_5 = arith.constant 5.000000e-01 : f32
    %6 = vector.broadcast %cst_5 : f32 to vector<128x256xf32>
    %7 = arith.mulf %6, %5 : vector<128x256xf32>
    %cst_6 = arith.constant 0.707106769 : f32
    %8 = vector.broadcast %cst_6 : f32 to vector<128x256xf32>
    %9 = arith.mulf %5, %8 : vector<128x256xf32>
    %10 = math.erf %9 : vector<128x256xf32>
    %cst_7 = arith.constant 1.000000e+00 : f32
    %11 = vector.broadcast %cst_7 : f32 to vector<128x256xf32>
    %12 = arith.addf %11, %10 : vector<128x256xf32>
    %13 = arith.mulf %7, %12 : vector<128x256xf32>
    %c0_8 = arith.constant 0 : index
    %c0_9 = arith.constant 0 : index
    %14 = vector.load %arg4[%c0_8, %c0_9] : memref<4x256xf32, #tpu.memory_space<vmem>>, vector<4x256xf32>
    %cst_10 = arith.constant dense<0.000000e+00> : vector<4x128xf32>
    %15 = tpu.matmul %14, %13, %cst_10 {dimension_numbers = #tpu.dot_dimension_numbers<[1], [1], [0], [0], [0, 0, 1, 0], [], []>} : vector<4x256xf32>, vector<128x256xf32>, vector<4x128xf32> -> vector<4x128xf32>
    %c0_11 = arith.constant 0 : index
    %c0_12 = arith.constant 0 : index
    %16 = memref.load %arg5[%c0_11, %c0_12] : memref<1x1xf32, #tpu.memory_space<smem>>
    %17 = vector.broadcast %16 : f32 to vector<4x128xf32>
    %18 = arith.addf %15, %17 : vector<4x128xf32>
    %19 = math.exp %18 : vector<4x128xf32>
    %c0_13 = arith.constant 0 : index
    %c0_14 = arith.constant 0 : index
    %c0_15 = arith.constant 0 : index
    %20 = vector.load %arg6[%c0_13, %c0_14, %c0_15] : memref<1x4x128xf32, #tpu.memory_space<vmem>>, vector<1x4x128xf32>
    %21 = vector.shape_cast %20 : vector<1x4x128xf32> to vector<4x128xf32>
    %22 = vector.shape_cast %19 : vector<4x128xf32> to vector<1x4x128xf32>
    tpu.vector_store %arg6[%c0_13, %c0_14, %c0_15], %22 {strides = array<i32>} : memref<1x4x128xf32, #tpu.memory_space<vmem>>, vector<1x4x128xf32>,
    return
  }
  func.func @transform_0(%arg0: i32) -> (i32, i32) {
    %c0_i32 = arith.constant 0 : i32
    %c0_i32_0 = arith.constant 0 : i32
    return %arg0, %c0_i32 : i32, i32
  }
  func.func @transform_1(%arg0: i32) -> (i32, i32) {
    %c0_i32 = arith.constant 0 : i32
    %c0_i32_0 = arith.constant 0 : i32
    %c0_i32_1 = arith.constant 0 : i32
    return %c0_i32, %c0_i32_0 : i32, i32
  }
  func.func @transform_2(%arg0: i32) -> (i32, i32) {
    %c0_i32 = arith.constant 0 : i32
    %c0_i32_0 = arith.constant 0 : i32
    %c0_i32_1 = arith.constant 0 : i32
    return %c0_i32, %c0_i32_0 : i32, i32
  }
  func.func @transform_3(%arg0: i32) -> (i32, i32) {
    %c0_i32 = arith.constant 0 : i32
    %c0_i32_0 = arith.constant 0 : i32
    %c0_i32_1 = arith.constant 0 : i32
    return %c0_i32, %c0_i32_0 : i32, i32
  }
  func.func @transform_4(%arg0: i32) -> (i32, i32) {
    %c0_i32 = arith.constant 0 : i32
    %c0_i32_0 = arith.constant 0 : i32
    %c0_i32_1 = arith.constant 0 : i32
    return %c0_i32, %c0_i32_0 : i32, i32
  }
  func.func @transform_5(%arg0: i32) -> (i32, i32, i32) {
    %c0_i32 = arith.constant 0 : i32
    %c0_i32_0 = arith.constant 0 : i32
    %c0_i32_1 = arith.constant 0 : i32
    return %arg0, %c0_i32, %c0_i32_0 : i32, i32, i32
  }
}

</mosaic_0001>

<bundles_post_ra>
// kernel: tpu_custom_call.1
= control target key start
LH: loop header
LB: loop body
LE: loop exit
PB: predicated region body
PF: predicated region fallthrough
CT: control target
= control target key end

     0   :  { %s1547_s0 = inlined_call_operand.hbm [shape: f32[250,128], index: 0, kind: input, shape index: {}]   ;;  %s1548_s1 = inlined_call_operand.hbm [shape: f32[128,256], index: 1, kind: input, shape index: {}]   ;;  %s1549_s2 = inlined_call_operand.vmem [shape: f32[1,256], index: 2, kind: input, shape index: {}]   ;;  %s1550_s3 = inlined_call_operand.vmem [shape: f32[4,256], index: 3, kind: input, shape index: {}]   ;;  %s1551_s4 = inlined_call_operand.<no memory space> [shape: f32[1,1], index: 4, kind: input, shape index: {}]   ;;  %s1552_s5 = inlined_call_operand.hbm [shape: f32[2,4,128], index: 5, kind: output, shape index: {}]  }
   0x1   :  { %10 = sst [smem:[#allocation2]] %s1551_s4 }
   0x2   :  { %11 = vsyncpa [#allocation4], 0 }
   0x3   :  { %13 = vsyncpa [#allocation4 + $0x1], 0 }
   0x4   :  { %14 = vsyncpa [#allocation7], 0 }
   0x5   :  { %15 = vsyncpa [#allocation5], 0 }
   0x6   :  { %17 = vsyncpa [#allocation5 + $0x1], 0  ;;  %s1194_s20 = smov 0   ;;  %s1196_s21 = smov 0  }
   0x7   :  { %s1198_s22 = smov 0   ;;  %s1200_s23 = smov 0  }
   0x8 LB: > { %s1215_s4 = sadd.s32 4294967295, %s1151_s23   ;;  %s814_s24 = sadd.s32 4294967294, %s1151_s23   ;;  %s1151_s23 = sphi %s1200_s23, %s1572_s23   ;;  %s1147_s22 = sphi %s1198_s22, %s1571_s22   ;;  %s1143_s21 = sphi %s1196_s21, %s1570_s21   ;;  %s1139_s20 = sphi %s1194_s20, %s1569_s20  }
   0x9   : > { %p43_p0 = scmp.ne.s32.totalorder %s1143_s21, %s1139_s20  ;;  %p1553_p1 = scmp.eq.s32.totalorder %s1215_s4, 0 }
   0xa   : > { %p157_p3 = scmp.eq.s32.totalorder %s814_s24, 1  ;;  %p815_p5 = scmp.ge.s32.totalorder %s1151_s23, 1 }
   0xb   : > { %p1224_p4 = por %p1553_p1, %p43_p0  ;;  %p164_p7 = scmp.lt.s32.totalorder %s1151_s23, 3 }
   0xc   : > { %p1229_p6 = por %p157_p3, %p43_p0  ;;  %s1153_s28 = smov [#allocation6]  }
   0xd   : > { %s1556_s25 = scalar_select %p1224_p4, 1, 0 }
   0xe   : > { %s1557_s26 = scalar_select %p1229_p6, 1, 0 }
   0xf   : > { %p1234_p8 = pnand %p815_p5, %p164_p7  ;;  %s176_s29 = sshll.u32 %s1153_s28, 4  ;;  %s1238_s29 = int_to_ptr.vmem [resolvable:$true] %s176_s29 }
  0x10   : > { %s1250_s6 = sadd.s32 1, %s1151_s23   ;;  %s30_s7 = sadd.s32 1, %s1147_s22 }
  0x11   : > { %s1558_s27 = scalar_select %p1234_p8, 1, 0 }
  0x12   : > { %p902_p9 = pneg %p1234_p8  ;;  %s27_s8 = ssub.s32 %s1151_s23, %s1250_s6 }
  0x13   : > { %s1023_s11 = scalar_lea.hbm %s1548_s1, 4096 }
  0x14   : > { %p1245_p11 = pnand %p902_p9, %p1553_p1  ;;  %p1024_p12 = scmp.ne.s32.totalorder %s1548_s1, %s1023_s11 }
  0x15   : > { %p1030_p5 = scmp.lt.u32.totalorder %s1023_s11, %s1548_s1 }
  0x16   : > { %p1025_p13 = pneg %p1245_p11 }
  0x18   : > { %p1026_p0 = pnand %p1025_p13, %p1024_p12 }
  0x1a   : > { %p1027_p3 = pneg %p1026_p0 }
  0x1c   : > { %p1032_p7 = pnand %p1030_p5, %p1027_p3 }
  0x1e   : > { %1035 = shalt.err (!%p1032_p7)
}
  0x1f   : > { %s1036_s16 = scalar_lea.vmem %s1238_s29, 4096  ;;  %p1044_p2 = scmp.lt.s32.totalorder %s1238_s29, %s1238_s29 }
  0x20   : > { %p1037_p9 = scmp.ne.s32.totalorder %s1238_s29, %s1036_s16  ;;  %p1045_p6 = scmp.lt.s32.totalorder %s1036_s16, %s1036_s16 }
  0x22   : > { %p1039_p10 = pnand %p1037_p9, %p1025_p13  ;;  %p1046_p4 = por %p1045_p6, %p1044_p2 }
  0x24   : > { %p1040_p1 = pneg %p1039_p10 }
  0x26   : > { %p1047_p8 = pnand %p1046_p4, %p1040_p1 }
  0x28   : > { %1050 = shalt.err (!%p1047_p8)
}
  0x29   : > { %s1154_s17 = smov 256   ;;  %s1155_s18 = smov 16  }
  0x2a   : > { %905 = dma.hbm_to_vmem [thread:$0]  (!%p1245_p11), %s1548_s1, 4096, %s1238_s29, [#allocation7], %s1154_s17, %s1154_s17, %s1155_s18  }
  0x2b   : > { %p28_p2 = scmp.eq.s32.totalorder %s27_s8, 0  ;;  %p37_p1 = scmp.ne.s32.totalorder %s1147_s22, %s1143_s21 }
  0x2c   : > { %p38_p4 = scmp.eq.s32.totalorder %s1151_s23, 0  ;;  %p915_p6 = scmp.lt.s32.totalorder %s1151_s23, 2 }
  0x2d   : > { %s1281_s28 = scalar_select %p28_p2, %s1147_s22, %s30_s7  }
  0x2e   : > { %p39_p8 = por %p38_p4, %p37_p1  ;;  %p1560_p10 = scmp.eq.s32.totalorder %s1215_s4, 1 }
  0x2f   : > { %s199_s10 = sand.u32 1, %s1147_s22   ;;  %s829_s11 = sshll.u32 %s1151_s23, 11 }
  0x30   : > { %p1285_p12 = por %p1560_p10, %p37_p1  ;;  %s818_s12 = sshll.u32 %s199_s10, 7 }
  0x31   : > { %s1294_s14 = scalar_lea.hbm %s1547_s0, %s829_s11  ;;  %s203_s29 = scalar_lea.vmem [#allocation3], %s818_s12 }
  0x32   : > { %s210_s7 = sshll.u32 %s203_s29, 4  ;;  %p1296_p11 = pnand %p915_p6, %p39_p8  ;;  %s1300_s7 = int_to_ptr.vmem [resolvable:$true] %s210_s7 }
  0x33   : > { %s1302_s15 = scalar_lea.sflag [#allocation4], %s199_s10  ;;  %s1051_s16 = scalar_lea.hbm %s1294_s14, 2048 }
  0x34   : > { %p1052_p13 = scmp.ne.s32.totalorder %s1294_s14, %s1051_s16  ;;  %p1053_p0 = pneg %p1296_p11 }
  0x35   : > { %s1056_s19 = scalar_lea.hbm %s1547_s0, 4096  ;;  %p1057_p7 = scmp.lt.u32.totalorder %s1294_s14, %s1547_s0 }
  0x36   : > { %p1054_p3 = pnand %p1053_p0, %p1052_p13  ;;  %p1058_p9 = scmp.lt.u32.totalorder %s1056_s19, %s1051_s16 }
  0x37   : > { %p1060_p1 = scmp.lt.u32.totalorder %s1051_s16, %s1294_s14 }
  0x38   : > { %p1055_p5 = pneg %p1054_p3  ;;  %p1059_p2 = por %p1058_p9, %p1057_p7 }
  0x3a   : > { %p1061_p4 = por %p1060_p1, %p1059_p2 }
  0x3c   : > { %p1062_p6 = pnand %p1061_p4, %p1055_p5 }
  0x3e   : > { %1065 = shalt.err (!%p1062_p6)
}
  0x3f   : > { %s1066_s10 = scalar_lea.vmem %s1300_s7, 2048  ;;  %s1156_s12 = smov [#allocation3]  }
  0x40   : > { %p1067_p8 = scmp.ne.s32.totalorder %s1300_s7, %s1066_s10  ;;  %s1071_s30 = sshll.u32 %s1156_s12, 4  ;;  %s1072_s30 = int_to_ptr.vmem [resolvable:$false] %s1071_s30 }
  0x41   : > { %s1073_s13 = scalar_lea.vmem %s1072_s30, 4096  ;;  %p1074_p3 = scmp.lt.s32.totalorder %s1300_s7, %s1072_s30 }
  0x42   : > { %p1069_p10 = pnand %p1067_p8, %p1053_p0  ;;  %p1075_p7 = scmp.lt.s32.totalorder %s1073_s13, %s1066_s10 }
  0x44   : > { %p1070_p13 = pneg %p1069_p10  ;;  %p1076_p9 = por %p1075_p7, %p1074_p3 }
  0x46   : > { %p1077_p2 = pnand %p1076_p9, %p1070_p13 }
  0x48   : > { %1080 = shalt.err (!%p1077_p2)
}
  0x49   : > { %s1157_s29 = smov 128   ;;  %s1158_s16 = smov 8  }
  0x4a   : > { %909 = dma.hbm_to_vmem [thread:$0]  (!%p1296_p11), %s1294_s14, 2048, %s1300_s7, %s1302_s15, %s1157_s29, %s1157_s29, %s1158_s16  }
  0x4b   : > { %p1563_p0 = scmp.ne.s32.totalorder %s1558_s27, 0 }
  0x4c   : > { %s1333_s17 = sand.u32 (!%p1563_p0), 1, %s1143_s21   ;;  %p1564_p5 = scmp.ne.s32.totalorder (!%p1563_p0), %s1556_s25, 0 }
  0x4d   : > { %222 = sbr.rel (%p1563_p0) target bundleno = 666 (0x29a), region = 40  ;;  %s822_s18 = sshll.u32 (!%p1563_p0), %s1333_s17, 7 }
  0x4e   : > { %s225_s19 = scalar_lea.sflag (!%p1563_p0), [#allocation4], %s1333_s17  ;;  %s1337_s24 = scalar_lea.vmem (!%p1563_p0), [#allocation3], %s822_s18 }
  0x54   : > { %1126 = dma.done.wait (%p1564_p5), %s225_s19, 2048  }
  0x55   : > { %1128 = vsyncadd (%p1564_p5), %s225_s19, 4294965248  ;;  %p1565_p11 = scmp.eq.s32.totalorder %s1215_s4, 0 }
  0x57   : > { %1130 = dma.done.wait (%p1565_p11), [#allocation7], 4096   ;;  %p1566_p1 = pmov %p1565_p11 }
  0x58   : > { %v1159_v0 = vmov 0.0   ;;  %v277_v1 = vld [vmem:[#allocation6 + $0x8] sm:$0xff]  ;;  %v279_v2 = vld [vmem:[#allocation6 + $0x18] sm:$0xff]  ;;  %v276_v3 = vld [vmem:[#allocation6] sm:$0xff]  ;;  %s642_s8 = sld [smem:[#allocation2]]  ;;  %s824_s15 = sshll.u32 %s1333_s17, 2 }
  0x59   : > { %1132 = vsyncadd (%p1566_p1), [#allocation7], 4294963200  ;;  %384 = vmatprep.mubr.f32.mxu0 %v1159_v0  ;;  %v830_v4 = vpack.c.bf16 %v279_v2, %v277_v1  ;;  %v278_v5 = vld [vmem:[#allocation6 + $0x10] sm:$0xff]  ;;  %v281_v6 = vld [vmem:[#allocation6 + $0x28] sm:$0xff]  ;;  %s826_s11 = sshll.u32 %s1215_s4, 6  ;;  %s258_s10 = scalar_lea.vmem [#allocation8], %s824_s15 }
  0x5a   : > { %v283_v7 = vld [vmem:[#allocation6 + $0x38] sm:$0xff]  ;;  %v832_v8 = vpack.c.bf16 %v278_v5, %v276_v3  ;;  %v280_v10 = vld [vmem:[#allocation6 + $0x20] sm:$0xff]  ;;  %v282_v11 = vld [vmem:[#allocation6 + $0x30] sm:$0xff]  ;;  %s734_s12 = sshll.u32 %s258_s10, 4  ;;  %s1503_s29 = scalar_lea.hbm %s1552_s5, %s826_s11  ;;  %s1505_s12 = int_to_ptr.vmem [resolvable:$true] %s734_s12 }
  0x5b   : > { %v834_v9 = vpack.c.bf16 %v283_v7, %v281_v6  ;;  %v285_v12 = vld [vmem:[#allocation6 + $0x48] sm:$0xff]  ;;  %831 = vmatprep.subr.bf16.mxu0 %v830_v4  ;;  %v287_v13 = vld [vmem:[#allocation6 + $0x58] sm:$0xff]  ;;  %v836_v14 = vpack.c.bf16 %v282_v11, %v280_v10  ;;  %v284_v16 = vld [vmem:[#allocation6 + $0x40] sm:$0xff]  ;;  %v310_v4 = vlaneseq  ;;  %s721_s16 = scalar_lea.sflag [#allocation5], %s1333_s17  ;;  %s1081_s18 = scalar_lea.vmem %s1505_s12, 64 }
  0x5c   : > { %833 = vmatpush1.bf16.msra.mxu0 %v832_v8  ;;  %v838_v15 = vpack.c.bf16 %v287_v13, %v285_v12  ;;  %v286_v17 = vld [vmem:[#allocation6 + $0x50] sm:$0xff]  ;;  %v289_v18 = vld [vmem:[#allocation6 + $0x68] sm:$0xff]  ;;  %v291_v19 = vld [vmem:[#allocation6 + $0x78] sm:$0xff]  ;;  %p1082_p4 = scmp.ne.s32.totalorder %s1505_s12, %s1081_s18  ;;  %s1160_s4 = smov [#allocation8]  }
  0x5d   : > { %835 = vmatprep.subr.bf16.mxu0 %v834_v9  ;;  %v840_v20 = vpack.c.bf16 %v286_v17, %v284_v16  ;;  %v842_v21 = vpack.c.bf16 %v291_v19, %v289_v18  ;;  %v288_v22 = vld [vmem:[#allocation6 + $0x60] sm:$0xff]  ;;  %v290_v23 = vld [vmem:[#allocation6 + $0x70] sm:$0xff]  ;;  %v293_v24 = vld [vmem:[#allocation6 + $0x88] sm:$0xff]  ;;  %v311_v5 = vshrl.u32 %v310_v4, 7  ;;  %s1085_s19 = sshll.u32 %s1160_s4, 4  ;;  %s1086_s19 = int_to_ptr.vmem [resolvable:$false] %s1085_s19 }
  0x5e   : > { %v295_v25 = vld [vmem:[#allocation6 + $0x98] sm:$0xff]  ;;  %v844_v26 = vpack.c.bf16 %v290_v23, %v288_v22  ;;  %v292_v28 = vld [vmem:[#allocation6 + $0x80] sm:$0xff]  ;;  %v294_v29 = vld [vmem:[#allocation6 + $0x90] sm:$0xff]  ;;  %p1083_p6 = pnand %p1082_p4, %p1285_p12  ;;  %p1088_p10 = scmp.lt.s32.totalorder %s1505_s12, %s1086_s19 }
  0x5f   : > { %v846_v27 = vpack.c.bf16 %v295_v25, %v293_v24  ;;  %v297_v30 = vld [vmem:[#allocation6 + $0xa8] sm:$0xff]  ;;  %v299_v31 = vld [vmem:[#allocation6 + $0xb8] sm:$0xff]  ;;  %v848_v32 = vpack.c.bf16 %v294_v29, %v292_v28  ;;  %v296_v34 = vld [vmem:[#allocation6 + $0xa0] sm:$0xff]  ;;  %v312_v6 = vsub.s32 0, %v311_v5  ;;  %v316_v8 = vsub.s32 1, %v311_v5 }
  0x60   : > { %837 = vmatpush1.bf16.msra.mxu0 %v836_v14  ;;  %v850_v33 = vpack.c.bf16 %v299_v31, %v297_v30  ;;  %v298_v35 = vld [vmem:[#allocation6 + $0xb0] sm:$0xff]  ;;  %v301_v36 = vld [vmem:[#allocation6 + $0xc8] sm:$0xff]  ;;  %v303_v37 = vld [vmem:[#allocation6 + $0xd8] sm:$0xff]  ;;  %p1084_p8 = pneg %p1083_p6 }
  0x61   : > { %839 = vmatprep.subr.bf16.mxu0 %v838_v15  ;;  %v852_v38 = vpack.c.bf16 %v298_v35, %v296_v34  ;;  %v854_v39 = vpack.c.bf16 %v303_v37, %v301_v36  ;;  %v300_v40 = vld [vmem:[#allocation6 + $0xc0] sm:$0xff]  ;;  %v302_v41 = vld [vmem:[#allocation6 + $0xd0] sm:$0xff]  ;;  %v305_v42 = vld [vmem:[#allocation6 + $0xe8] sm:$0xff] }
  0x62   : > { %v307_v43 = vld [vmem:[#allocation6 + $0xf8] sm:$0xff]  ;;  %v856_v44 = vpack.c.bf16 %v302_v41, %v300_v40  ;;  %v304_v46 = vld [vmem:[#allocation6 + $0xe0] sm:$0xff]  ;;  %v306_v47 = vld [vmem:[#allocation6 + $0xf0] sm:$0xff] }
  0x63   : > { %v858_v45 = vpack.c.bf16 %v307_v43, %v305_v42  ;;  %v860_v48 = vpack.c.bf16 %v306_v47, %v304_v46  ;;  %v260_v49 = vld [vmem:[%s1337_s24] sm:$0xff]  ;;  %v261_v50 = vld [vmem:[%s1337_s24 + $0x8] sm:$0xff]  ;;  %v262_v51 = vld [vmem:[%s1337_s24 + $0x10] sm:$0xff] }
  0x64   : > { %841 = vmatpush1.bf16.msra.mxu0 %v840_v20  ;;  %v263_v52 = vld [vmem:[%s1337_s24 + $0x18] sm:$0xff]  ;;  %v264_v53 = vld [vmem:[%s1337_s24 + $0x20] sm:$0xff]  ;;  %v265_v54 = vld [vmem:[%s1337_s24 + $0x28] sm:$0xff] }
  0x65   : > { %843 = vmatprep.subr.bf16.mxu0 %v842_v21  ;;  %v266_v55 = vld [vmem:[%s1337_s24 + $0x30] sm:$0xff]  ;;  %v267_v56 = vld [vmem:[%s1337_s24 + $0x38] sm:$0xff]  ;;  %v268_v57 = vld [vmem:[%s1337_s24 + $0x40] sm:$0xff] }
  0x66   : > { %v269_v58 = vld [vmem:[%s1337_s24 + $0x48] sm:$0xff]  ;;  %v270_v59 = vld [vmem:[%s1337_s24 + $0x50] sm:$0xff]  ;;  %v271_v60 = vld [vmem:[%s1337_s24 + $0x58] sm:$0xff] }
  0x67   : > { %v272_v61 = vld [vmem:[%s1337_s24 + $0x60] sm:$0xff]  ;;  %v273_v62 = vld [vmem:[%s1337_s24 + $0x68] sm:$0xff]  ;;  %v274_v63 = vld [vmem:[%s1337_s24 + $0x70] sm:$0xff] }
  0x68   : > { %845 = vmatpush1.bf16.msra.mxu0 %v844_v26  ;;  %v275_v1 = vld [vmem:[%s1337_s24 + $0x78] sm:$0xff]  ;;  %v1382_v2 = vld [vmem:[%s1550_s3] sm:$0xff]  ;;  %s1087_s24 = scalar_lea.vmem %s1086_s19, 128 }
  0x69   : > { %847 = vmatprep.subr.bf16.mxu0 %v846_v27  ;;  %v645_v3 = vcombine.high %v1382_v2, %v1382_v2  ;;  %v308_v7 = vld [vmem:[%s1549_s2] sm:$0x3]  ;;  %p1089_p13 = scmp.lt.s32.totalorder %s1087_s24, %s1081_s18 }
  0x6a   : > { %v1391_v9 = vrot.slane %v308_v7, %v316_v8 }
  0x6b   : > { %711 = vmatprep.mubr.f32.mxu1 %v645_v3  ;;  %p1090_p3 = por %p1089_p13, %p1088_p10 }
  0x6c   : > { %849 = vmatpush1.bf16.msra.mxu0 %v848_v32 }
  0x6d   : > { %851 = vmatprep.subr.bf16.mxu0 %v850_v33  ;;  %p1091_p7 = pnand %p1090_p3, %p1084_p8 }
  0x70   : > { %853 = vmatpush1.bf16.msra.mxu0 %v852_v38 }
  0x71   : > { %855 = vmatprep.subr.bf16.mxu0 %v854_v39 }
  0x74   : > { %857 = vmatpush1.bf16.msra.mxu0 %v856_v44 }
  0x75   : > { %859 = vmatprep.subr.bf16.mxu0 %v858_v45 }
  0x78   : > { %861 = vmatpush1.bf16.msra.mxu0 %v860_v48 }
  0x7b   : > { %385 = vmatmul.mubr.f32.vlgmr.msra.gmra.mrb[0].mxu0 %v260_v49 }
  0x7c   : > { %390 = vmatprep.mubr.f32.mxu0 %v1159_v0 }
  0x7f   : > { %391 = vmatmul.mubr.f32.gmra.mrb[2].mxu0 %v261_v50 }
  0x80   : > { %396 = vmatprep.mubr.f32.mxu0 %v1159_v0 }
  0x83   : > { %397 = vmatmul.mubr.f32.gmra.mrb[4].mxu0 %v262_v51 }
  0x84   : > { %402 = vmatprep.mubr.f32.mxu0 %v1159_v0 }
  0x87   : > { %403 = vmatmul.mubr.f32.gmra.mrb[6].mxu0 %v263_v52 }
  0x88   : > { %408 = vmatprep.mubr.f32.mxu0 %v1159_v0 }
  0x8b   : > { %409 = vmatmul.mubr.f32.gmra.mrb[8].mxu0 %v264_v53 }
  0x8c   : > { %414 = vmatprep.mubr.f32.mxu0 %v1159_v0 }
  0x8f   : > { %415 = vmatmul.mubr.f32.gmra.mrb[10].mxu0 %v265_v54 }
  0x90   : > { %420 = vmatprep.mubr.f32.mxu0 %v1159_v0 }
  0x93   : > { %421 = vmatmul.mubr.f32.gmra.mrb[12].mxu0 %v266_v55 }
  0x94   : > { %426 = vmatprep.mubr.f32.mxu0 %v1159_v0 }
  0x97   : > { %427 = vmatmul.mubr.f32.gmra.mrb[14].mxu0 %v267_v56 }
  0x98   : > { %432 = vmatprep.mubr.f32.mxu0 %v1159_v0 }
  0x9b   : > { %433 = vmatmul.mubr.f32.gmra.mrb[16].mxu0 %v268_v57 }
  0x9c   : > { %438 = vmatprep.mubr.f32.mxu0 %v1159_v0 }
  0x9f   : > { %439 = vmatmul.mubr.f32.gmra.mrb[18].mxu0 %v269_v58 }
  0xa0   : > { %444 = vmatprep.mubr.f32.mxu0 %v1159_v0 }
  0xa3   : > { %445 = vmatmul.mubr.f32.gmra.mrb[20].mxu0 %v270_v59 }
  0xa4   : > { %450 = vmatprep.mubr.f32.mxu0 %v1159_v0 }
  0xa7   : > { %451 = vmatmul.mubr.f32.gmra.mrb[22].mxu0 %v271_v60 }
  0xa8   : > { %456 = vmatprep.mubr.f32.mxu0 %v1159_v0 }
  0xab   : > { %457 = vmatmul.mubr.f32.gmra.mrb[24].mxu0 %v272_v61 }
  0xac   : > { %462 = vmatprep.mubr.f32.mxu0 %v1159_v0 }
  0xaf   : > { %463 = vmatmul.mubr.f32.gmra.mrb[26].mxu0 %v273_v62 }
  0xb0   : > { %468 = vmatprep.mubr.f32.mxu0 %v1159_v0 }
  0xb3   : > { %469 = vmatmul.mubr.f32.gmra.mrb[28].mxu0 %v274_v63 }
  0xb4   : > { %474 = vmatprep.mubr.f32.mxu0 %v1159_v0  ;;  %v1389_v0 = vrot.slane %v308_v7, %v312_v6 }
  0xb7   : > { %475 = vmatmul.mubr.f32.gmra.mrb[30].mxu0 %v275_v1 }
 0x14e   : > { %v386_v10 = vpop.f32.mrb[0].mxu0 }
 0x14f   : > { %v387_v11 = vadd.f32 %v386_v10, %v1389_v0  ;;  %v388_v12 = vpop.f32.mrb[1].mxu0 }
 0x150   : > { %v389_v13 = vadd.f32 %v388_v12, %v1391_v9 }
 0x151   : > { %v513_v14 = vmul.f32 0.70710677, %v387_v11  ;;  %v481_v42 = vmul.f32 0.5, %v387_v11 }
 0x152   : > { %v514_v15 = vmul.f32 0.70710677, %v389_v13  ;;  %v392_v16 = vpop.f32.mrb[2].mxu0  ;;  %v482_v46 = vmul.f32 0.5, %v389_v13 }
 0x153   : > { %957 = verf.f32 %v513_v14  ;;  %v393_v17 = vadd.f32 %v392_v16, %v1389_v0  ;;  %v394_v18 = vpop.f32.mrb[3].mxu0 }
 0x154   : > { %959 = verf.f32 %v514_v15  ;;  %v395_v19 = vadd.f32 %v394_v18, %v1391_v9 }
 0x155   : > { %v515_v20 = vmul.f32 0.70710677, %v393_v17  ;;  %v483_v47 = vmul.f32 0.5, %v393_v17 }
 0x156   : > { %v516_v21 = vmul.f32 0.70710677, %v395_v19  ;;  %v398_v22 = vpop.f32.mrb[4].mxu0  ;;  %v484_v51 = vmul.f32 0.5, %v395_v19 }
 0x157   : > { %961 = verf.f32 %v515_v20  ;;  %v399_v23 = vadd.f32 %v398_v22, %v1389_v0  ;;  %v400_v24 = vpop.f32.mrb[5].mxu0 }
 0x158   : > { %963 = verf.f32 %v516_v21  ;;  %v401_v25 = vadd.f32 %v400_v24, %v1391_v9 }
 0x159   : > { %v517_v26 = vmul.f32 0.70710677, %v399_v23  ;;  %v485_v11 = vmul.f32 0.5, %v399_v23 }
 0x15a   : > { %v518_v27 = vmul.f32 0.70710677, %v401_v25  ;;  %v404_v28 = vpop.f32.mrb[6].mxu0  ;;  %v486_v15 = vmul.f32 0.5, %v401_v25 }
 0x15b   : > { %965 = verf.f32 %v517_v26  ;;  %v405_v29 = vadd.f32 %v404_v28, %v1389_v0  ;;  %v406_v30 = vpop.f32.mrb[7].mxu0 }
 0x15c   : > { %967 = verf.f32 %v518_v27  ;;  %v407_v31 = vadd.f32 %v406_v30, %v1391_v9 }
 0x15d   : > { %v958_v32 = vpop.eup %957  ;;  %v519_v33 = vmul.f32 0.70710677, %v405_v29  ;;  %v487_v16 = vmul.f32 0.5, %v405_v29 }
 0x15e   : > { %v960_v34 = vpop.eup %959  ;;  %v520_v35 = vmul.f32 0.70710677, %v407_v31  ;;  %v410_v36 = vpop.f32.mrb[8].mxu0  ;;  %v577_v40 = vadd.f32 1.0, %v958_v32  ;;  %v488_v20 = vmul.f32 0.5, %v407_v31 }
 0x15f   : > { %969 = verf.f32 %v519_v33  ;;  %v1402_v37 = vadd.f32 %v410_v36, %v1389_v0  ;;  %v412_v38 = vpop.f32.mrb[9].mxu0  ;;  %v578_v44 = vadd.f32 1.0, %v960_v34 }
 0x160   : > { %971 = verf.f32 %v520_v35  ;;  %v1405_v39 = vadd.f32 %v412_v38, %v1391_v9  ;;  %v609_v56 = vmul.f32 %v577_v40, %v481_v42 }
 0x161   : > { %v962_v41 = vpop.eup %961  ;;  %v521_v43 = vmul.f32 0.70710677, %v1402_v37  ;;  %v610_v60 = vmul.f32 %v578_v44, %v482_v46 }
 0x162   : > { %v964_v45 = vpop.eup %963  ;;  %v522_v48 = vmul.f32 0.70710677, %v1405_v39  ;;  %v416_v49 = vpop.f32.mrb[10].mxu0  ;;  %v579_v50 = vadd.f32 1.0, %v962_v41 }
 0x163   : > { %973 = verf.f32 %v521_v43  ;;  %v1410_v52 = vadd.f32 %v416_v49, %v1389_v0  ;;  %v418_v53 = vpop.f32.mrb[11].mxu0  ;;  %v580_v54 = vadd.f32 1.0, %v964_v45  ;;  %v489_v43 = vmul.f32 0.5, %v1402_v37 }
 0x164   : > { %975 = verf.f32 %v522_v48  ;;  %v1413_v55 = vadd.f32 %v418_v53, %v1391_v9  ;;  %v611_v57 = vmul.f32 %v579_v50, %v483_v47  ;;  %v490_v47 = vmul.f32 0.5, %v1405_v39 }
 0x165   : > { %v966_v58 = vpop.eup %965  ;;  %v523_v59 = vmul.f32 0.70710677, %v1410_v52  ;;  %v612_v61 = vmul.f32 %v580_v54, %v484_v51  ;;  %v491_v48 = vmul.f32 0.5, %v1410_v52 }
 0x166   : > { %v968_v62 = vpop.eup %967  ;;  %v524_v63 = vmul.f32 0.70710677, %v1413_v55  ;;  %v422_v1 = vpop.f32.mrb[12].mxu0  ;;  %v864_v3 = vpack.c.bf16 %v611_v57, %v609_v56  ;;  %v581_v7 = vadd.f32 1.0, %v966_v58  ;;  %v492_v53 = vmul.f32 0.5, %v1413_v55 }
 0x167   : > { %977 = verf.f32 %v523_v59  ;;  %v1418_v4 = vadd.f32 %v422_v1, %v1389_v0  ;;  %v424_v5 = vpop.f32.mrb[13].mxu0  ;;  %v862_v6 = vpack.c.bf16 %v612_v61, %v610_v60  ;;  %v582_v12 = vadd.f32 1.0, %v968_v62 }
 0x168   : > { %979 = verf.f32 %v524_v63  ;;  %v1421_v8 = vadd.f32 %v424_v5, %v1391_v9  ;;  %v613_v23 = vmul.f32 %v581_v7, %v485_v11 }
 0x169   : > { %v970_v10 = vpop.eup %969  ;;  %v525_v13 = vmul.f32 0.70710677, %v1418_v4  ;;  %863 = vmatprep.subr.bf16.mxu1 %v862_v6  ;;  %v614_v28 = vmul.f32 %v582_v12, %v486_v15  ;;  %v493_v12 = vmul.f32 0.5, %v1418_v4 }
 0x16a   : > { %v972_v14 = vpop.eup %971  ;;  %v583_v17 = vadd.f32 1.0, %v970_v10  ;;  %v526_v18 = vmul.f32 0.70710677, %v1421_v8  ;;  %v428_v19 = vpop.f32.mrb[14].mxu0  ;;  %865 = vmatpush1.bf16.xpose.msra.mxu1 %v864_v3 }
 0x16b   : > { %v584_v21 = vadd.f32 1.0, %v972_v14  ;;  %981 = verf.f32 %v525_v13  ;;  %v1426_v22 = vadd.f32 %v428_v19, %v1389_v0  ;;  %v430_v24 = vpop.f32.mrb[15].mxu0 }
 0x16c   : > { %v615_v26 = vmul.f32 %v583_v17, %v487_v16  ;;  %983 = verf.f32 %v526_v18  ;;  %v1429_v27 = vadd.f32 %v430_v24, %v1391_v9  ;;  %v494_v16 = vmul.f32 0.5, %v1421_v8 }
 0x16d   : > { %v974_v25 = vpop.eup %973  ;;  %v616_v29 = vmul.f32 %v584_v21, %v488_v20  ;;  %v527_v30 = vmul.f32 0.70710677, %v1426_v22  ;;  %v495_v17 = vmul.f32 0.5, %v1426_v22 }
 0x16e   : > { %v976_v32 = vpop.eup %975  ;;  %v528_v31 = vmul.f32 0.70710677, %v1429_v27  ;;  %v434_v33 = vpop.f32.mrb[16].mxu0  ;;  %v868_v34 = vpack.c.bf16 %v615_v26, %v613_v23  ;;  %v585_v40 = vadd.f32 1.0, %v974_v25  ;;  %v496_v21 = vmul.f32 0.5, %v1429_v27 }
 0x16f   : > { %985 = verf.f32 %v527_v30  ;;  %v1434_v35 = vadd.f32 %v434_v33, %v1389_v0  ;;  %v436_v36 = vpop.f32.mrb[17].mxu0  ;;  %v866_v38 = vpack.c.bf16 %v616_v29, %v614_v28  ;;  %v586_v44 = vadd.f32 1.0, %v976_v32 }
 0x170   : > { %987 = verf.f32 %v528_v31  ;;  %v1437_v41 = vadd.f32 %v436_v36, %v1391_v9  ;;  %v617_v57 = vmul.f32 %v585_v40, %v489_v43 }
 0x171   : > { %v978_v42 = vpop.eup %977  ;;  %v529_v45 = vmul.f32 0.70710677, %v1434_v35  ;;  %867 = vmatprep.subr.bf16.mxu1 %v866_v38  ;;  %v618_v59 = vmul.f32 %v586_v44, %v490_v47  ;;  %v497_v44 = vmul.f32 0.5, %v1434_v35 }
 0x172   : > { %v980_v46 = vpop.eup %979  ;;  %v587_v49 = vadd.f32 1.0, %v978_v42  ;;  %v530_v50 = vmul.f32 0.70710677, %v1437_v41  ;;  %v440_v51 = vpop.f32.mrb[18].mxu0  ;;  %869 = vmatpush1.bf16.xpose.msra.mxu1 %v868_v34 }
 0x173   : > { %v588_v54 = vadd.f32 1.0, %v980_v46  ;;  %989 = verf.f32 %v529_v45  ;;  %v1446_v37 = vadd.f32 %v440_v51, %v1389_v0  ;;  %v442_v56 = vpop.f32.mrb[19].mxu0 }
 0x174   : > { %v619_v58 = vmul.f32 %v587_v49, %v491_v48  ;;  %991 = verf.f32 %v530_v50  ;;  %v1449_v39 = vadd.f32 %v442_v56, %v1391_v9  ;;  %v498_v48 = vmul.f32 0.5, %v1437_v41 }
 0x175   : > { %v982_v52 = vpop.eup %981  ;;  %v620_v60 = vmul.f32 %v588_v54, %v492_v53  ;;  %v531_v61 = vmul.f32 0.70710677, %v1446_v37  ;;  %v499_v49 = vmul.f32 0.5, %v1446_v37 }
 0x176   : > { %v984_v62 = vpop.eup %983  ;;  %v532_v55 = vmul.f32 0.70710677, %v1449_v39  ;;  %v446_v63 = vpop.f32.mrb[20].mxu0  ;;  %v872_v1 = vpack.c.bf16 %v619_v58, %v617_v57  ;;  %v589_v7 = vadd.f32 1.0, %v982_v52  ;;  %v500_v54 = vmul.f32 0.5, %v1449_v39 }
 0x177   : > { %993 = verf.f32 %v531_v61  ;;  %v1454_v3 = vadd.f32 %v446_v63, %v1389_v0  ;;  %v448_v5 = vpop.f32.mrb[21].mxu0  ;;  %v870_v6 = vpack.c.bf16 %v620_v60, %v618_v59  ;;  %v590_v13 = vadd.f32 1.0, %v984_v62 }
 0x178   : > { %995 = verf.f32 %v532_v55  ;;  %v1457_v10 = vadd.f32 %v448_v5, %v1391_v9  ;;  %v621_v26 = vmul.f32 %v589_v7, %v493_v12 }
 0x179   : > { %v986_v11 = vpop.eup %985  ;;  %v533_v14 = vmul.f32 0.70710677, %v1454_v3  ;;  %871 = vmatprep.subr.bf16.mxu1 %v870_v6  ;;  %v622_v28 = vmul.f32 %v590_v13, %v494_v16  ;;  %v501_v13 = vmul.f32 0.5, %v1454_v3 }
 0x17a   : > { %v988_v15 = vpop.eup %987  ;;  %v591_v18 = vadd.f32 1.0, %v986_v11  ;;  %v534_v19 = vmul.f32 0.70710677, %v1457_v10  ;;  %v452_v20 = vpop.f32.mrb[22].mxu0  ;;  %873 = vmatpush1.bf16.xpose.msra.mxu1 %v872_v1 }
 0x17b   : > { %v592_v24 = vadd.f32 1.0, %v988_v15  ;;  %997 = verf.f32 %v533_v14  ;;  %v1466_v4 = vadd.f32 %v452_v20, %v1389_v0  ;;  %v454_v23 = vpop.f32.mrb[23].mxu0 }
 0x17c   : > { %v623_v25 = vmul.f32 %v591_v18, %v495_v17  ;;  %999 = verf.f32 %v534_v19  ;;  %v1469_v8 = vadd.f32 %v454_v23, %v1391_v9  ;;  %v502_v17 = vmul.f32 0.5, %v1457_v10 }
 0x17d   : > { %v990_v22 = vpop.eup %989  ;;  %v624_v29 = vmul.f32 %v592_v24, %v496_v21  ;;  %v535_v30 = vmul.f32 0.70710677, %v1466_v4  ;;  %v503_v18 = vmul.f32 0.5, %v1466_v4 }
 0x17e   : > { %v992_v32 = vpop.eup %991  ;;  %v536_v27 = vmul.f32 0.70710677, %v1469_v8  ;;  %v458_v31 = vpop.f32.mrb[24].mxu0  ;;  %v876_v33 = vpack.c.bf16 %v623_v25, %v621_v26  ;;  %v593_v40 = vadd.f32 1.0, %v990_v22  ;;  %v504_v24 = vmul.f32 0.5, %v1469_v8 }
 0x17f   : > { %1001 = verf.f32 %v535_v30  ;;  %v1474_v34 = vadd.f32 %v458_v31, %v1389_v0  ;;  %v460_v36 = vpop.f32.mrb[25].mxu0  ;;  %v874_v38 = vpack.c.bf16 %v624_v29, %v622_v28  ;;  %v594_v45 = vadd.f32 1.0, %v992_v32 }
 0x180   : > { %1003 = verf.f32 %v536_v27  ;;  %v1477_v42 = vadd.f32 %v460_v36, %v1391_v9  ;;  %v625_v58 = vmul.f32 %v593_v40, %v497_v44 }
 0x181   : > { %v994_v43 = vpop.eup %993  ;;  %v537_v46 = vmul.f32 0.70710677, %v1474_v34  ;;  %875 = vmatprep.subr.bf16.mxu1 %v874_v38  ;;  %v626_v60 = vmul.f32 %v594_v45, %v498_v48  ;;  %v505_v40 = vmul.f32 0.5, %v1474_v34 }
 0x182   : > { %v996_v47 = vpop.eup %995  ;;  %v595_v50 = vadd.f32 1.0, %v994_v43  ;;  %v538_v51 = vmul.f32 0.70710677, %v1477_v42  ;;  %v464_v53 = vpop.f32.mrb[26].mxu0  ;;  %877 = vmatpush1.bf16.xpose.msra.mxu1 %v876_v33 }
 0x183   : > { %v596_v56 = vadd.f32 1.0, %v996_v47  ;;  %1005 = verf.f32 %v537_v46  ;;  %v465_v35 = vadd.f32 %v464_v53, %v1389_v0  ;;  %v466_v57 = vpop.f32.mrb[27].mxu0 }
 0x184   : > { %v627_v52 = vmul.f32 %v595_v50, %v499_v49  ;;  %1007 = verf.f32 %v538_v51  ;;  %v467_v59 = vadd.f32 %v466_v57, %v1391_v9 }
 0x185   : > { %v998_v41 = vpop.eup %997  ;;  %v628_v37 = vmul.f32 %v596_v56, %v500_v54  ;;  %v539_v61 = vmul.f32 0.70710677, %v465_v35  ;;  %v507_v43 = vmul.f32 0.5, %v465_v35 }
 0x186   : > { %v1000_v62 = vpop.eup %999  ;;  %v540_v55 = vmul.f32 0.70710677, %v467_v59  ;;  %v470_v63 = vpop.f32.mrb[28].mxu0  ;;  %v880_v1 = vpack.c.bf16 %v627_v52, %v625_v58  ;;  %v597_v7 = vadd.f32 1.0, %v998_v41  ;;  %v508_v45 = vmul.f32 0.5, %v467_v59 }
 0x187   : > { %1009 = verf.f32 %v539_v61  ;;  %v471_v39 = vadd.f32 %v470_v63, %v1389_v0  ;;  %v472_v5 = vpop.f32.mrb[29].mxu0  ;;  %v878_v6 = vpack.c.bf16 %v628_v37, %v626_v60  ;;  %v598_v14 = vadd.f32 1.0, %v1000_v62 }
 0x188   : > { %1011 = verf.f32 %v540_v55  ;;  %v473_v11 = vadd.f32 %v472_v5, %v1391_v9  ;;  %v629_v3 = vmul.f32 %v597_v7, %v501_v13 }
 0x189   : > { %v1002_v12 = vpop.eup %1001  ;;  %v541_v15 = vmul.f32 0.70710677, %v471_v39  ;;  %879 = vmatprep.subr.bf16.mxu1 %v878_v6  ;;  %v630_v10 = vmul.f32 %v598_v14, %v502_v17  ;;  %v509_v35 = vmul.f32 0.5, %v471_v39  ;;  %v643_v39 = vstv %s642_s8 }
 0x18a   : > { %v1004_v16 = vpop.eup %1003  ;;  %v599_v19 = vadd.f32 1.0, %v1002_v12  ;;  %v542_v20 = vmul.f32 0.70710677, %v473_v11  ;;  %v476_v21 = vpop.f32.mrb[30].mxu0  ;;  %881 = vmatpush1.bf16.xpose.msra.mxu1 %v880_v1 }
 0x18b   : > { %v600_v23 = vadd.f32 1.0, %v1004_v16  ;;  %1013 = verf.f32 %v541_v15  ;;  %v477_v26 = vadd.f32 %v476_v21, %v1389_v0  ;;  %v478_v25 = vpop.f32.mrb[31].mxu0 }
 0x18c   : > { %v631_v22 = vmul.f32 %v599_v19, %v503_v18  ;;  %1015 = verf.f32 %v542_v20  ;;  %v479_v28 = vadd.f32 %v478_v25, %v1391_v9  ;;  %v506_v9 = vmul.f32 0.5, %v1477_v42 }
 0x18d   : > { %v1006_v29 = vpop.eup %1005  ;;  %v632_v30 = vmul.f32 %v600_v23, %v504_v24  ;;  %v543_v4 = vmul.f32 0.70710677, %v477_v26  ;;  %v511_v41 = vmul.f32 0.5, %v477_v26  ;;  %v510_v42 = vmul.f32 0.5, %v473_v11 }
 0x18e   : > { %v1008_v32 = vpop.eup %1007  ;;  %v544_v27 = vmul.f32 0.70710677, %v479_v28  ;;  %v884_v31 = vpack.c.bf16 %v631_v22, %v629_v3  ;;  %v601_v8 = vadd.f32 1.0, %v1006_v29  ;;  %v512_v59 = vmul.f32 0.5, %v479_v28 }
 0x18f   : > { %1017 = verf.f32 %v543_v4  ;;  %v882_v33 = vpack.c.bf16 %v632_v30, %v630_v10  ;;  %v602_v38 = vadd.f32 1.0, %v1008_v32 }
 0x190   : > { %1019 = verf.f32 %v544_v27  ;;  %v633_v47 = vmul.f32 %v601_v8, %v505_v40 }
 0x191   : > { %v1010_v36 = vpop.eup %1009  ;;  %883 = vmatprep.subr.bf16.mxu1 %v882_v33  ;;  %v634_v50 = vmul.f32 %v602_v38, %v506_v9 }
 0x192   : > { %v1012_v0 = vpop.eup %1011  ;;  %v603_v44 = vadd.f32 1.0, %v1010_v36  ;;  %885 = vmatpush1.bf16.xpose.msra.mxu1 %v884_v31 }
 0x193   : > { %v604_v46 = vadd.f32 1.0, %v1012_v0 }
 0x194   : > { %v635_v48 = vmul.f32 %v603_v44, %v507_v43 }
 0x195   : > { %v1014_v49 = vpop.eup %1013  ;;  %v636_v51 = vmul.f32 %v604_v46, %v508_v45 }
 0x196   : > { %v1016_v53 = vpop.eup %1015  ;;  %v888_v54 = vpack.c.bf16 %v635_v48, %v633_v47  ;;  %v605_v57 = vadd.f32 1.0, %v1014_v49 }
 0x197   : > { %v886_v56 = vpack.c.bf16 %v636_v51, %v634_v50  ;;  %v606_v52 = vadd.f32 1.0, %v1016_v53 }
 0x198   : > { %v637_v61 = vmul.f32 %v605_v57, %v509_v35 }
 0x199   : > { %v1018_v58 = vpop.eup %1017  ;;  %887 = vmatprep.subr.bf16.mxu1 %v886_v56  ;;  %v638_v55 = vmul.f32 %v606_v52, %v510_v42 }
 0x19a   : > { %v1020_v34 = vpop.eup %1019  ;;  %v607_v60 = vadd.f32 1.0, %v1018_v58  ;;  %889 = vmatpush1.bf16.xpose.msra.mxu1 %v888_v54 }
 0x19b   : > { %v608_v37 = vadd.f32 1.0, %v1020_v34 }
 0x19c   : > { %v639_v62 = vmul.f32 %v607_v60, %v511_v41 }
 0x19d   : > { %v640_v63 = vmul.f32 %v608_v37, %v512_v59 }
 0x19e   : > { %v892_v1 = vpack.c.bf16 %v639_v62, %v637_v61 }
 0x19f   : > { %v890_v5 = vpack.c.bf16 %v640_v63, %v638_v55 }
 0x1a1   : > { %891 = vmatprep.subr.bf16.mxu1 %v890_v5 }
 0x1a2   : > { %893 = vmatpush1.bf16.xpose.msra.mxu1 %v892_v1 }
 0x1a9   : > { %712 = vmatmul.mubr.f32.vlgmr.msra.gmra.mrb[0].mxu1 %v1382_v2 }
 0x27c   : > { %v713_v6 = vpop.f32.mrb[0].mxu1 }
 0x27d   : > { %v714_v7 = vadd.f32 %v713_v6, %v643_v39  ;;  %v715_v11 = vpop.f32.mrb[1].mxu1 }
 0x27f   : > { %v717_v12 = vmul.f32 1.442695, %v714_v7 }
 0x281   : > { %1021 = vpow2.f32 %v717_v12 }
 0x28b   : > { %v1022_v2 = vpop.eup %1021 }
 0x28c   : > { %719 = vst [vmem:[%s258_s10] sm:$0xf] %v1022_v2 }
 0x28d   : > { %1094 = shalt.err (!%p1091_p7)
}
 0x28e   : > { %s1095_s17 = scalar_lea.hbm %s1503_s29, 64  ;;  %s1099_s14 = scalar_lea.hbm %s1552_s5, 128 }
 0x28f   : > { %p1096_p9 = scmp.ne.s32.totalorder %s1503_s29, %s1095_s17  ;;  %p1100_p5 = scmp.lt.u32.totalorder %s1503_s29, %s1552_s5 }
 0x290   : > { %p1101_p11 = scmp.lt.u32.totalorder %s1099_s14, %s1095_s17  ;;  %p1103_p4 = scmp.lt.u32.totalorder %s1095_s17, %s1503_s29 }
 0x291   : > { %p1097_p2 = pnand %p1096_p9, %p1285_p12 }
 0x292   : > { %p1102_p1 = por %p1101_p11, %p1100_p5 }
 0x293   : > { %p1098_p0 = pneg %p1097_p2 }
 0x294   : > { %p1104_p6 = por %p1103_p4, %p1102_p1 }
 0x296   : > { %p1105_p8 = pnand %p1104_p6, %p1098_p0 }
 0x298   : > { %1108 = shalt.err (!%p1105_p8)
}
 0x299   : > { %900 = dma.vmem_to_hbm [thread:$0]  (%p1285_p12), %s1505_s12, 64, %s1503_s29, %s721_s16  }
 0x29a PF: > { %s746_s15 = sand.u32 1, %s1139_s20   ;;  %p1567_p10 = scmp.ne.s32.totalorder %s1557_s26, 0 }
 0x29b   : > { %p1568_p13 = scmp.ge.s32.totalorder %s1151_s23, 2  ;;  %s747_s11 = scalar_lea.sflag [#allocation5], %s746_s15 }
 0x29d   : > { %p911_p3 = pnand %p1568_p13, %p1567_p10 }
 0x29f   : > { %1134 = dma.done.wait (!%p911_p3), %s747_s11, 64  }
 0x2a0   : > { %1136 = vsyncadd (!%p911_p3), %s747_s11, 4294967232  ;;  %p20_p7 = scmp.ge.s32.totalorder %s1250_s6, 4   ;;  %s1569_s20 = smov %s1143_s21 }
 0x2a1   : > { %s1570_s21 = smov %s1147_s22  ;;  %s1571_s22 = smov %s1281_s28 }
 0x2a2   : > { %s1572_s23 = smov %s1250_s6  ;;  %22 = sbr.rel (!%p20_p7) target bundleno = 8 (0x8), region = 89 }
 0x2a9   :  { %752 = vsyncpa [#allocation4], 1 }
 0x2aa   :  { %754 = vsyncpa [#allocation4 + $0x1], 1 }
 0x2ab   :  { %755 = vsyncpa [#allocation7], 1 }
 0x2ac   :  { %756 = vsyncpa [#allocation5], 1 }
 0x2ad   :  { %758 = vsyncpa [#allocation5 + $0x1], 1 }

</bundles_post_ra>
